<compile_context>
chip_gen: v7x
topology: tpu7x:2x2x1
jax: 0.10.0
libtpu: 0.0.40
codegen_flags: <defaults>
</compile_context>

<pallas_src>
import jax
import jax.numpy as jnp
from jax.experimental import pallas as pl
from jax.experimental.pallas import tpu as pltpu

_Z_TOKENS = 64  # the reference module always splits off the first 64 tokens


def _eca_kernel(w_ref, b_ref, x_ref, o_ref):
    # w_ref: SMEM f32[3]   Conv1d(1, 1, kernel_size=3, padding=1) weights
    # b_ref: SMEM f32[1]   Conv1d bias
    # x_ref: VMEM (bt, N, C) tokens; [:64] = z group, [64:] = x group
    # o_ref: VMEM (bt, N, C) gated output == torch.cat((z_gated, x_gated), dim=1)
    bt, _, c = x_ref.shape
    w0 = w_ref[0]
    w1 = w_ref[1]
    w2 = w_ref[2]
    bias = b_ref[0]

    zero_col = jnp.zeros((bt, 1, 1), jnp.float32)

    def channel_gate(m):
        # m: (bt, 1, C) f32 per-channel mean.
        # y[c] = w0*m[c-1] + w1*m[c] + w2*m[c+1] + b   (zero padding at the edges)
        m_prev = jnp.concatenate([zero_col, m[:, :, : c - 1]], axis=2)
        m_next = jnp.concatenate([m[:, :, 1:], zero_col], axis=2)
        return jax.nn.sigmoid(w0 * m_prev + w1 * m + w2 * m_next + bias)

    # z group: tokens [0, 64).  Mean (== AdaptiveAvgPool2d(1)) accumulated in f32,
    # kept 3D (bt, 1, C) so the broadcast multiply needs no relayout.
    mz = jnp.mean(x_ref[:, :_Z_TOKENS, :].astype(jnp.float32), axis=1, keepdims=True)
    gz = channel_gate(mz).astype(o_ref.dtype)
    # Re-read the tokens from VMEM for the multiply (cheap vld) instead of holding the
    # whole block live in vregs across the reduction; fused multiply-store, no scratch.
    o_ref[:, :_Z_TOKENS, :] = x_ref[:, :_Z_TOKENS, :] * gz

    # x group: tokens [64, N).
    mx = jnp.mean(x_ref[:, _Z_TOKENS:, :].astype(jnp.float32), axis=1, keepdims=True)
    gx = channel_gate(mx).astype(o_ref.dtype)
    o_ref[:, _Z_TOKENS:, :] = x_ref[:, _Z_TOKENS:, :] * gx


def _num_tensorcores() -> int:
    """Best-effort TensorCore count of the local device (v7x has 2, v5e/v6e have 1)."""
    try:
        dev = jax.devices()[0]
        return max(1, int(getattr(dev, "num_cores", 1) or 1))
    except Exception:  # pragma: no cover - conservative fallback
        return 1


def eca_attention(x, w, b, *, target_block_bytes=8 << 20, num_cores=None):
    """Forward of ECAAttention.

    x: (B, N, C) tokens with N = 64 (z group) + Nx (x group).
    w: (3,) Conv1d(1,1,3,padding=1) weight, b: (1,) Conv1d bias.
    Returns (B, N, C), identical layout to torch.cat((z_gated, x_gated), dim=1).
    """
    B, N, C = x.shape
    assert N > _Z_TOKENS, "need at least one x-group token after the first 64"

    # SMEM scalar path is 32-bit: always feed the conv params as f32.
    w = jnp.reshape(jnp.asarray(w, jnp.float32), (3,))
    b = jnp.reshape(jnp.asarray(b, jnp.float32), (1,))

    if num_cores is None:
        num_cores = _num_tensorcores()

    # --- Batch tiling ------------------------------------------------------
    # Pure HBM-streaming kernel: pick large blocks (~8 MiB) so the fixed per-step
    # overhead is a few percent of the DMA time, but keep blocks small enough that
    # 2x(in)+2x(out) double-buffered tiles fit comfortably under a 48 MiB VMEM cap
    # (portable to v7x's 64 MiB/TC).
    per_batch_bytes = N * C * x.dtype.itemsize
    bt = int(max(1, min(B, target_block_bytes // per_batch_bytes)))
    max_block_bytes = 11 << 20
    bt = min(bt, max(1, max_block_bytes // per_batch_bytes))
    # Only multi-TensorCore chips (v7x) benefit from splitting the parallel batch
    # axis: aim for >=2 (ideally 4) grid steps per core so both cores stream and
    # the in-DMA / compute / out-DMA pipeline reaches steady state.
    if num_cores > 1 and B >= 2 * num_cores:
        steps_per_core = 4 if B >= 4 * num_cores else 2
        bt = min(bt, max(1, B // (steps_per_core * num_cores)))
    bt = max(1, min(bt, B))

    grid = (pl.cdiv(B, bt),)  # partial tail block is fine: rows are independent.

    block_bytes = bt * per_batch_bytes
    vmem_limit = int(min(48 << 20, max(16 << 20, 4 * block_bytes + (4 << 20))))

    # Advisory cost: read x once, write out once; a handful of flops/element.
    cost = pl.CostEstimate(
        flops=int(4 * B * N * C),
        transcendentals=int(2 * B * C),
        bytes_accessed=int(2 * B * N * C * x.dtype.itemsize),
    )

    return pl.pallas_call(
        _eca_kernel,
        out_shape=jax.ShapeDtypeStruct((B, N, C), x.dtype),
        grid=grid,
        in_specs=[
            pl.BlockSpec(memory_space=pltpu.MemorySpace.SMEM),   # conv weight (3,)
            pl.BlockSpec(memory_space=pltpu.MemorySpace.SMEM),   # conv bias (1,)
            pl.BlockSpec((bt, N, C), lambda i: (i, 0, 0)),       # tokens
        ],
        out_specs=pl.BlockSpec((bt, N, C), lambda i: (i, 0, 0)),
        compiler_params=pltpu.CompilerParams(
            dimension_semantics=("parallel",),
            vmem_limit_bytes=vmem_limit,
        ),
        cost_estimate=cost,
    )(w, b, x)


def eca_attention_ref(x, w, b):
    """Pure-JAX reference mirroring the PyTorch semantics."""
    def gate(t):
        m = t.astype(jnp.float32).mean(axis=1)          # (B, C)
        mp = jnp.pad(m, ((0, 0), (1, 1)))
        y = w[0] * mp[:, :-2] + w[1] * mp[:, 1:-1] + w[2] * mp[:, 2:] + b[0]
        return t * jax.nn.sigmoid(y)[:, None, :].astype(t.dtype)
    return jnp.concatenate([gate(x[:, :_Z_TOKENS, :]), gate(x[:, _Z_TOKENS:, :])], axis=1)


if __name__ == "__main__":
    key = jax.random.PRNGKey(0)
    kx, kw, kb = jax.random.split(key, 3)

    B, C = 2, 128
    N = 64 + 16          # 64 z-tokens (8x8 patch) + 16 x-tokens (4x4 patch)

    x = jax.random.normal(kx, (B, N, C), dtype=jnp.float32)
    # Deterministic Conv1d(1, 1, kernel_size=3, padding=1) parameters.
    w = 0.3 * jax.random.normal(kw, (3,), dtype=jnp.float32)
    bias = 0.1 * jax.random.normal(kb, (1,), dtype=jnp.float32)

    out = jax.block_until_ready(eca_attention(x, w, bias))
    ref = eca_attention_ref(x, w, bias)

    assert out.shape == (B, N, C)
    assert jnp.allclose(out, ref, atol=1e-5, rtol=1e-5)
    print("KERNEL_OK")
</pallas_src>

<mosaic_0001>
module attributes {stable_mosaic.version = 11 : i64} {
  func.func @_eca_kernel(%arg0: i32, %arg1: memref<3xf32, #tpu.memory_space<smem>>, %arg2: memref<1xf32, #tpu.memory_space<smem>>, %arg3: memref<2x80x128xf32, #tpu.memory_space<vmem>>, %arg4: memref<2x80x128xf32, #tpu.memory_space<vmem>>) attributes {dimension_semantics = [#tpu.dimension_semantics<parallel>], iteration_bounds = array<i64: 1>, scalar_prefetch = 0 : i64, scratch_operands = 0 : i64, tpu.core_type = #tpu.core_type<tc>, window_params = [{transform_indices = @transform_0, window_bounds = array<i64: 3>}, {transform_indices = @transform_1, window_bounds = array<i64: 1>}, {transform_indices = @transform_2, window_bounds = array<i64: 2, 80, 128>}, {transform_indices = @transform_3, window_bounds = array<i64: 2, 80, 128>}]} {
    %c0 = arith.constant 0 : index
    %0 = memref.load %arg1[%c0] : memref<3xf32, #tpu.memory_space<smem>>
    %c1 = arith.constant 1 : index
    %1 = memref.load %arg1[%c1] : memref<3xf32, #tpu.memory_space<smem>>
    %c2 = arith.constant 2 : index
    %2 = memref.load %arg1[%c2] : memref<3xf32, #tpu.memory_space<smem>>
    %c0_0 = arith.constant 0 : index
    %3 = memref.load %arg2[%c0_0] : memref<1xf32, #tpu.memory_space<smem>>
    %cst = arith.constant 0.000000e+00 : f32
    %4 = vector.broadcast %cst : f32 to vector<2x1x1xf32>
    %c0_1 = arith.constant 0 : index
    %c0_2 = arith.constant 0 : index
    %c0_3 = arith.constant 0 : index
    %5 = vector.load %arg3[%c0_1, %c0_2, %c0_3] : memref<2x80x128xf32, #tpu.memory_space<vmem>>, vector<2x64x128xf32>
    %cst_4 = arith.constant dense<0.000000e+00> : vector<2x128xf32>
    %6 = vector.multi_reduction <add>, %5, %cst_4 [1] : vector<2x64x128xf32> to vector<2x128xf32>
    %7 = vector.shape_cast %6 : vector<2x128xf32> to vector<2x1x128xf32>
    %cst_5 = arith.constant 6.400000e+01 : f32
    %8 = vector.broadcast %cst_5 : f32 to vector<2x1x128xf32>
    %9 = arith.divf %7, %8 : vector<2x1x128xf32>
    %10 = vector.extract_strided_slice %9 {offsets = [0, 0, 0], sizes = [2, 1, 127], strides = [1, 1, 1]} : vector<2x1x128xf32> to vector<2x1x127xf32>
    %11 = tpu.concatenate %4, %10 in 2 : vector<2x1x1xf32>, vector<2x1x127xf32> -> vector<2x1x128xf32>
    %12 = vector.extract_strided_slice %9 {offsets = [0, 0, 1], sizes = [2, 1, 127], strides = [1, 1, 1]} : vector<2x1x128xf32> to vector<2x1x127xf32>
    %13 = tpu.concatenate %12, %4 in 2 : vector<2x1x127xf32>, vector<2x1x1xf32> -> vector<2x1x128xf32>
    %14 = vector.broadcast %0 : f32 to vector<2x1x128xf32>
    %15 = arith.mulf %14, %11 : vector<2x1x128xf32>
    %16 = vector.broadcast %1 : f32 to vector<2x1x128xf32>
    %17 = arith.mulf %16, %9 : vector<2x1x128xf32>
    %18 = arith.addf %15, %17 : vector<2x1x128xf32>
    %19 = vector.broadcast %2 : f32 to vector<2x1x128xf32>
    %20 = arith.mulf %19, %13 : vector<2x1x128xf32>
    %21 = arith.addf %18, %20 : vector<2x1x128xf32>
    %22 = vector.broadcast %3 : f32 to vector<2x1x128xf32>
    %23 = arith.addf %21, %22 : vector<2x1x128xf32>
    %24 = arith.negf %23 : vector<2x1x128xf32>
    %25 = math.exp %24 : vector<2x1x128xf32>
    %cst_6 = arith.constant 1.000000e+00 : f32
    %26 = vector.broadcast %cst_6 : f32 to vector<2x1x128xf32>
    %27 = arith.addf %26, %25 : vector<2x1x128xf32>
    %28 = arith.divf %26, %27 : vector<2x1x128xf32>
    %c0_7 = arith.constant 0 : index
    %c0_8 = arith.constant 0 : index
    %c0_9 = arith.constant 0 : index
    %29 = vector.load %arg3[%c0_7, %c0_8, %c0_9] : memref<2x80x128xf32, #tpu.memory_space<vmem>>, vector<2x64x128xf32>
    %30 = vector.broadcast %28 : vector<2x1x128xf32> to vector<2x64x128xf32>
    %31 = arith.mulf %29, %30 : vector<2x64x128xf32>
    %c0_10 = arith.constant 0 : index
    %c0_11 = arith.constant 0 : index
    %c0_12 = arith.constant 0 : index
    %32 = vector.load %arg4[%c0_10, %c0_11, %c0_12] : memref<2x80x128xf32, #tpu.memory_space<vmem>>, vector<2x64x128xf32>
    tpu.vector_store %arg4[%c0_10, %c0_11, %c0_12], %31 {strides = array<i32>} : memref<2x80x128xf32, #tpu.memory_space<vmem>>, vector<2x64x128xf32>,
    %c0_13 = arith.constant 0 : index
    %c64 = arith.constant 64 : index
    %c0_14 = arith.constant 0 : index
    %33 = vector.load %arg3[%c0_13, %c64, %c0_14] : memref<2x80x128xf32, #tpu.memory_space<vmem>>, vector<2x16x128xf32>
    %cst_15 = arith.constant dense<0.000000e+00> : vector<2x128xf32>
    %34 = vector.multi_reduction <add>, %33, %cst_15 [1] : vector<2x16x128xf32> to vector<2x128xf32>
    %35 = vector.shape_cast %34 : vector<2x128xf32> to vector<2x1x128xf32>
    %cst_16 = arith.constant 1.600000e+01 : f32
    %36 = vector.broadcast %cst_16 : f32 to vector<2x1x128xf32>
    %37 = arith.divf %35, %36 : vector<2x1x128xf32>
    %38 = vector.extract_strided_slice %37 {offsets = [0, 0, 0], sizes = [2, 1, 127], strides = [1, 1, 1]} : vector<2x1x128xf32> to vector<2x1x127xf32>
    %39 = tpu.concatenate %4, %38 in 2 : vector<2x1x1xf32>, vector<2x1x127xf32> -> vector<2x1x128xf32>
    %40 = vector.extract_strided_slice %37 {offsets = [0, 0, 1], sizes = [2, 1, 127], strides = [1, 1, 1]} : vector<2x1x128xf32> to vector<2x1x127xf32>
    %41 = tpu.concatenate %40, %4 in 2 : vector<2x1x127xf32>, vector<2x1x1xf32> -> vector<2x1x128xf32>
    %42 = vector.broadcast %0 : f32 to vector<2x1x128xf32>
    %43 = arith.mulf %42, %39 : vector<2x1x128xf32>
    %44 = vector.broadcast %1 : f32 to vector<2x1x128xf32>
    %45 = arith.mulf %44, %37 : vector<2x1x128xf32>
    %46 = arith.addf %43, %45 : vector<2x1x128xf32>
    %47 = vector.broadcast %2 : f32 to vector<2x1x128xf32>
    %48 = arith.mulf %47, %41 : vector<2x1x128xf32>
    %49 = arith.addf %46, %48 : vector<2x1x128xf32>
    %50 = vector.broadcast %3 : f32 to vector<2x1x128xf32>
    %51 = arith.addf %49, %50 : vector<2x1x128xf32>
    %52 = arith.negf %51 : vector<2x1x128xf32>
    %53 = math.exp %52 : vector<2x1x128xf32>
    %cst_17 = arith.constant 1.000000e+00 : f32
    %54 = vector.broadcast %cst_17 : f32 to vector<2x1x128xf32>
    %55 = arith.addf %54, %53 : vector<2x1x128xf32>
    %56 = arith.divf %54, %55 : vector<2x1x128xf32>
    %c0_18 = arith.constant 0 : index
    %c64_19 = arith.constant 64 : index
    %c0_20 = arith.constant 0 : index
    %57 = vector.load %arg3[%c0_18, %c64_19, %c0_20] : memref<2x80x128xf32, #tpu.memory_space<vmem>>, vector<2x16x128xf32>
    %58 = vector.broadcast %56 : vector<2x1x128xf32> to vector<2x16x128xf32>
    %59 = arith.mulf %57, %58 : vector<2x16x128xf32>
    %c0_21 = arith.constant 0 : index
    %c64_22 = arith.constant 64 : index
    %c0_23 = arith.constant 0 : index
    %60 = vector.load %arg4[%c0_21, %c64_22, %c0_23] : memref<2x80x128xf32, #tpu.memory_space<vmem>>, vector<2x16x128xf32>
    tpu.vector_store %arg4[%c0_21, %c64_22, %c0_23], %59 {strides = array<i32>} : memref<2x80x128xf32, #tpu.memory_space<vmem>>, vector<2x16x128xf32>,
    return
  }
  func.func @transform_0(%arg0: i32) -> i32 {
    %c0_i32 = arith.constant 0 : i32
    %c0_i32_0 = arith.constant 0 : i32
    return %c0_i32 : i32
  }
  func.func @transform_1(%arg0: i32) -> i32 {
    %c0_i32 = arith.constant 0 : i32
    %c0_i32_0 = arith.constant 0 : i32
    return %c0_i32 : i32
  }
  func.func @transform_2(%arg0: i32) -> (i32, i32, i32) {
    %c0_i32 = arith.constant 0 : i32
    %c0_i32_0 = arith.constant 0 : i32
    %c0_i32_1 = arith.constant 0 : i32
    return %arg0, %c0_i32, %c0_i32_0 : i32, i32, i32
  }
  func.func @transform_3(%arg0: i32) -> (i32, i32, i32) {
    %c0_i32 = arith.constant 0 : i32
    %c0_i32_0 = arith.constant 0 : i32
    %c0_i32_1 = arith.constant 0 : i32
    return %arg0, %c0_i32, %c0_i32_0 : i32, i32, i32
  }
}

</mosaic_0001>

<bundles_post_ra>
// kernel: tpu_custom_call.1
= control target key start
LH: loop header
LB: loop body
LE: loop exit
PB: predicated region body
PF: predicated region fallthrough
CT: control target
= control target key end

     0   :  { %9 = vsyncpa [#allocation6], 0  ;;  %s519_s0 = inlined_call_operand.vmem [shape: f32[3], index: 0, kind: input, shape index: {}]   ;;  %s520_s1 = inlined_call_operand.<no memory space> [shape: f32[1], index: 1, kind: input, shape index: {}]   ;;  %s521_s2 = inlined_call_operand.hbm [shape: f32[2,80,128], index: 2, kind: input, shape index: {}]   ;;  %s522_s3 = inlined_call_operand.hbm [shape: f32[2,80,128], index: 3, kind: output, shape index: {}]  }
   0x1   :  { %10 = vsyncpa [#allocation4], 0 }
   0x2   :  { %11 = vsyncpa [#allocation5], 0  ;;  %s18_s14 = sshll.u32 %s519_s0, 4  ;;  %s19_s14 = int_to_ptr.vmem [resolvable:$true] %s18_s14 }
   0x3   :  { %s306_s15 = scalar_lea.vmem %s19_s14, 16  ;;  %p311_p1 = scmp.lt.s32.totalorder %s19_s14, %s19_s14 }
   0x4   :  { %p307_p0 = scmp.ne.s32.totalorder %s19_s14, %s306_s15  ;;  %p312_p2 = scmp.lt.s32.totalorder %s306_s15, %s306_s15 }
   0x6   :  { %p313_p3 = por %p312_p2, %p311_p1 }
   0x8   :  { %p314_p4 = pnand %p313_p3, %p307_p0 }
   0xa   :  { %317 = shalt.err (!%p314_p4)
}
   0xb   :  { %s368_s16 = smov [#allocation3]   ;;  %s369_s17 = smov [#allocation7]  }
   0xc   :  { %21 = dma.vmem_to_smem %s19_s14, 16, %s368_s16, [#allocation6]  }
   0xd   :  { %s29_s18 = sshll.u32 %s369_s17, 4  ;;  %s318_s21 = scalar_lea.hbm %s521_s2, 2560  ;;  %s30_s18 = int_to_ptr.vmem [resolvable:$true] %s29_s18 }
   0xe   :  { %p319_p5 = scmp.ne.s32.totalorder %s521_s2, %s318_s21  ;;  %p322_p6 = scmp.lt.u32.totalorder %s318_s21, %s521_s2 }
  0x10   :  { %p324_p7 = pnand %p322_p6, %p319_p5 }
  0x12   :  { %327 = shalt.err (!%p324_p7)
}
  0x13   :  { %s328_s25 = scalar_lea.vmem %s30_s18, 2560  ;;  %p333_p9 = scmp.lt.s32.totalorder %s30_s18, %s30_s18 }
  0x14   :  { %p329_p8 = scmp.ne.s32.totalorder %s30_s18, %s328_s25  ;;  %p334_p10 = scmp.lt.s32.totalorder %s328_s25, %s328_s25 }
  0x16   :  { %p335_p11 = por %p334_p10, %p333_p9 }
  0x18   :  { %p336_p12 = pnand %p335_p11, %p329_p8 }
  0x1a   :  { %339 = shalt.err (!%p336_p12)
}
  0x1b   :  { %s370_s26 = smov 128   ;;  %s371_s27 = smov 8  }
  0x1c   :  { %35 = dma.hbm_to_vmem [thread:$0]  %s521_s2, 2560, %s30_s18, [#allocation4], %s370_s26, %s370_s26, %s371_s27  }
  0x1d   :  { %362 = dma.done.wait [#allocation6], 16  }
  0x1e   :  { %363 = vsyncadd [#allocation6], 4294967280 }
  0x1f   :  { %364 = dma.done.wait [#allocation4], 2560  }
  0x20   :  { %365 = vsyncadd [#allocation4], 4294964736 }
  0x21   :  { %42 = sfence }
  0x22   :  { %v413_v0 = vld [vmem:[#allocation7 + $0x40] sm:$0xff]  ;;  %v415_v1 = vld [vmem:[#allocation7 + $0x48] sm:$0xff]  ;;  %v417_v2 = vld [vmem:[#allocation7 + $0x90] sm:$0xff]  ;;  %s372_s2 = smov 1   ;;  %s373_s30 = smov 127   ;;  %vm100_vm0 = vcmask 7168  }
  0x23   :  { %v184_v3 = vadd.f32 %v415_v1, %v413_v0  ;;  %v421_v4 = vld [vmem:[#allocation7 + $0x98] sm:$0xff]  ;;  %v423_v5 = vld [vmem:[#allocation7] sm:$0xff]  ;;  %v425_v6 = vld [vmem:[#allocation7 + $0x8] sm:$0xff]  ;;  %s43_s4 = sld [smem:[#allocation3]]  ;;  %s277_s5 = sld [smem:[#allocation3 + $0x1]]  ;;  %vm109_vm1 = vcmask 1039360  }
  0x24   :  { %v191_v7 = vadd.f32 %v421_v4, %v417_v2  ;;  %v429_v8 = vld [vmem:[#allocation7 + $0x10] sm:$0xff]  ;;  %v63_v9 = vadd.f32 %v425_v6, %v423_v5  ;;  %v433_v11 = vld [vmem:[#allocation7 + $0x18] sm:$0xff]  ;;  %v440_v16 = vld [vmem:[#allocation7 + $0x60] sm:$0xff]  ;;  %s278_s6 = sld [smem:[#allocation3 + $0x2]] }
  0x25   :  { %v185_v10 = vrot.slane %v184_v3, 4  ;;  %v436_v14 = vld [vmem:[#allocation7 + $0x50] sm:$0xff]  ;;  %v438_v15 = vld [vmem:[#allocation7 + $0x58] sm:$0xff]  ;;  %v442_v18 = vld [vmem:[#allocation7 + $0x20] sm:$0xff] }
  0x26   :  { %v192_v12 = vrot.slane %v191_v7, 4  ;;  %v64_v13 = vadd.f32 %v63_v9, %v429_v8  ;;  %v76_v19 = vadd.f32 %v438_v15, %v436_v14  ;;  %v447_v22 = vld [vmem:[#allocation7 + $0x68] sm:$0xff]  ;;  %v453_v28 = vld [vmem:[#allocation7 + $0x70] sm:$0xff]  ;;  %v459_v34 = vld [vmem:[#allocation7 + $0x78] sm:$0xff] }
  0x27   :  { %v186_v17 = vadd.f32 %v185_v10, %v184_v3  ;;  %v449_v24 = vld [vmem:[#allocation7 + $0x28] sm:$0xff]  ;;  %v455_v30 = vld [vmem:[#allocation7 + $0x30] sm:$0xff]  ;;  %v461_v36 = vld [vmem:[#allocation7 + $0x38] sm:$0xff] }
  0x28   :  { %v193_v20 = vadd.f32 %v192_v12, %v191_v7  ;;  %v65_v21 = vadd.f32 %v64_v13, %v433_v11  ;;  %v77_v25 = vadd.f32 %v76_v19, %v440_v16  ;;  %v465_v40 = vld [vmem:[#allocation7 + $0x80] sm:$0xff]  ;;  %v469_v45 = vld [vmem:[#allocation7 + $0x88] sm:$0xff] }
  0x29   :  { %v187_v23 = vrot.slane %v186_v17, 2  ;;  %v112_v12 = vstv %s43_s4  ;;  %v115_v13 = vstv %s277_s5 }
  0x2a   :  { %v194_v26 = vrot.slane %v193_v20, 2  ;;  %v66_v27 = vadd.f32 %v65_v21, %v442_v18  ;;  %v78_v31 = vadd.f32 %v77_v25, %v447_v22 }
  0x2b   :  { %v188_v29 = vadd.f32 %v187_v23, %v186_v17  ;;  %v120_v23 = vstv %s278_s6 }
  0x2c   :  { %v195_v32 = vadd.f32 %v194_v26, %v193_v20  ;;  %v67_v33 = vadd.f32 %v66_v27, %v449_v24  ;;  %v79_v37 = vadd.f32 %v78_v31, %v453_v28 }
  0x2d   :  { %v189_v35 = vrot.slane %v188_v29, 1 }
  0x2e   :  { %v196_v38 = vrot.slane %v195_v32, 1  ;;  %v68_v39 = vadd.f32 %v67_v33, %v455_v30  ;;  %v80_v42 = vadd.f32 %v79_v37, %v459_v34 }
  0x2f   :  { %v190_v41 = vadd.f32 %v189_v35, %v188_v29 }
  0x30   :  { %v197_v43 = vadd.f32 %v196_v38, %v195_v32  ;;  %v69_v44 = vadd.f32 %v68_v39, %v461_v36  ;;  %v81_v47 = vadd.f32 %v80_v42, %v465_v40 }
  0x31   :  { %v199_v46 = vmul.f32 0.0625, %v190_v41 }
  0x32   :  { %v70_v48 = vrot.slane %v69_v44, 4  ;;  %v200_v49 = vmul.f32 0.0625, %v197_v43  ;;  %v82_v50 = vadd.f32 %v81_v47, %v469_v45  ;;  %v125_v47 = vstv %s520_s1  ;;  %s374_s1 = smov [#allocation8]  }
  0x33   :  { %203 = vrot.lane.b32.xlu1 %v199_v46, %s372_s2  ;;  %s264_s9 = sshll.u32 %s374_s1, 4  ;;  %s265_s9 = int_to_ptr.vmem [resolvable:$true] %s264_s9 }
  0x34   :  { %v71_v51 = vadd.f32 %v70_v48, %v69_v44  ;;  %v83_v52 = vrot.slane %v82_v50, 4  ;;  %v222_v19 = vmul.f32 %v200_v49, %v115_v13  ;;  %v221_v44 = vmul.f32 %v199_v46, %v115_v13  ;;  %s340_s10 = scalar_lea.vmem %s265_s9, 2560  ;;  %p345_p0 = scmp.lt.s32.totalorder %s265_s9, %s265_s9 }
  0x35   :  { %p341_p13 = scmp.ne.s32.totalorder %s265_s9, %s340_s10  ;;  %p346_p1 = scmp.lt.s32.totalorder %s340_s10, %s340_s10 }
  0x36   :  { %v72_v53 = vrot.slane %v71_v51, 2  ;;  %v84_v54 = vadd.f32 %v83_v52, %v82_v50 }
  0x37   :  { %205 = vrot.lane.b32.xlu1 %v200_v49, %s372_s2  ;;  %p347_p2 = por %p346_p1, %p345_p0 }
  0x38   :  { %v73_v55 = vadd.f32 %v72_v53, %v71_v51  ;;  %v85_v56 = vrot.slane %v84_v54, 2 }
  0x39   :  { %p348_p3 = pnand %p347_p2, %p341_p13 }
  0x3a   :  { %v74_v57 = vrot.slane %v73_v55, 1  ;;  %v86_v58 = vadd.f32 %v85_v56, %v84_v54 }
  0x3c   :  { %v75_v59 = vadd.f32 %v74_v57, %v73_v55  ;;  %v87_v60 = vrot.slane %v86_v58, 1 }
  0x3e   :  { %v90_v61 = vmul.f32 0.015625, %v75_v59  ;;  %v88_v62 = vadd.f32 %v87_v60, %v86_v58 }
  0x40   :  { %94 = vrot.lane.b32.xlu0 %v90_v61, %s372_s2  ;;  %v91_v63 = vmul.f32 0.015625, %v88_v62  ;;  %v116_v32 = vmul.f32 %v115_v13, %v90_v61 }
  0x42   :  { %105 = vrot.lane.b32.xlu1 %v91_v63, %s373_s30  ;;  %v117_v27 = vmul.f32 %v115_v13, %v91_v63 }
  0x44   :  { %96 = vrot.lane.b32.xlu0 %v91_v63, %s372_s2 }
  0x46   :  { %213 = vrot.lane.b32.xlu1 %v200_v49, %s373_s30 }
  0x48   :  { %103 = vrot.lane.b32.xlu0 %v90_v61, %s373_s30 }
  0x4c   :  { %211 = vrot.lane.b32.xlu0 %v199_v46, %s373_s30 }
  0xa5   :  { %v204_v3 = vpop.permute.xlu1 %203 }
  0xa6   :  { %v209_v37 = vsel %vm100_vm0, 0.0, %v204_v3 }
  0xa7   :  { %v219_v50 = vmul.f32 %v209_v37, %v112_v12 }
  0xa9   :  { %v206_v7 = vpop.permute.xlu1 %205  ;;  %v223_v60 = vadd.f32 %v221_v44, %v219_v50 }
  0xaa   :  { %v210_v9 = vsel %vm100_vm0, 0.0, %v206_v7 }
  0xab   :  { %v220_v17 = vmul.f32 %v210_v9, %v112_v12 }
  0xad   :  { %v224_v38 = vadd.f32 %v222_v19, %v220_v17 }
  0xb2   :  { %v95_v10 = vpop.permute.xlu0 %94 }
  0xb3   :  { %v101_v20 = vsel %vm100_vm0, 0.0, %v95_v10 }
  0xb4   :  { %v106_v21 = vpop.permute.xlu1 %105  ;;  %v113_v31 = vmul.f32 %v112_v12, %v101_v20  ;;  %v140_v20 = vlaneseq }
  0xb5   :  { %v111_v25 = vsel %vm109_vm1, %v106_v21, 0.0 }
  0xb6   :  { %v97_v26 = vpop.permute.xlu0 %96  ;;  %v122_v33 = vmul.f32 %v120_v23, %v111_v25  ;;  %v118_v51 = vadd.f32 %v116_v32, %v113_v31 }
  0xb7   :  { %v102_v29 = vsel %vm100_vm0, 0.0, %v97_v26  ;;  %v141_v26 = vshrl.u32 %v140_v20, 7 }
  0xb8   :  { %v114_v35 = vmul.f32 %v112_v12, %v102_v29  ;;  %v214_v39 = vpop.permute.xlu1 %213 }
  0xb9   :  { %v218_v42 = vsel %vm109_vm1, %v214_v39, 0.0  ;;  %v142_v29 = vsub.s32 0, %v141_v26 }
  0xba   :  { %v119_v41 = vadd.f32 %v117_v27, %v114_v35  ;;  %v104_v43 = vpop.permute.xlu0 %103  ;;  %v226_v48 = vmul.f32 %v218_v42, %v120_v23 }
  0xbb   :  { %v110_v49 = vsel %vm109_vm1, %v104_v43, 0.0 }
  0xbc   :  { %v124_v52 = vadd.f32 %v122_v33, %v119_v41  ;;  %v121_v53 = vmul.f32 %v120_v23, %v110_v49  ;;  %v228_v54 = vadd.f32 %v226_v48, %v224_v38 }
  0xbe   :  { %v127_v55 = vadd.f32 %v125_v47, %v124_v52  ;;  %v123_v56 = vadd.f32 %v121_v53, %v118_v51  ;;  %v212_v57 = vpop.permute.xlu0 %211  ;;  %v230_v58 = vadd.f32 %v228_v54, %v125_v47 }
  0xbf   :  { %v217_v59 = vsel %vm109_vm1, %v212_v57, 0.0 }
  0xc0   :  { %v280_v46 = vmul.f32 -1.442695, %v127_v55  ;;  %v126_v61 = vadd.f32 %v125_v47, %v123_v56  ;;  %v225_v62 = vmul.f32 %v217_v59, %v120_v23  ;;  %v282_v63 = vmul.f32 -1.442695, %v230_v58 }
  0xc2   :  { %290 = vpow2.f32 %v280_v46  ;;  %v279_v3 = vmul.f32 -1.442695, %v126_v61  ;;  %v227_v7 = vadd.f32 %v225_v62, %v223_v60 }
  0xc3   :  { %292 = vpow2.f32 %v282_v63 }
  0xc4   :  { %294 = vpow2.f32 %v279_v3  ;;  %v229_v9 = vadd.f32 %v227_v7, %v125_v47 }
  0xc6   :  { %v281_v10 = vmul.f32 -1.442695, %v229_v9 }
  0xc8   :  { %296 = vpow2.f32 %v281_v10 }
  0xcc   :  { %v291_v12 = vpop.eup %290 }
  0xcd   :  { %v293_v13 = vpop.eup %292  ;;  %v135_v17 = vadd.f32 1.0, %v291_v12 }
  0xce   :  { %v295_v19 = vpop.eup %294  ;;  %v238_v21 = vadd.f32 1.0, %v293_v13 }
  0xcf   :  { %298 = vrcp.f32 %v135_v17  ;;  %v134_v25 = vadd.f32 1.0, %v295_v19 }
  0xd0   :  { %300 = vrcp.f32 %v238_v21 }
  0xd1   :  { %302 = vrcp.f32 %v134_v25 }
  0xd2   :  { %v297_v23 = vpop.eup %296 }
  0xd3   :  { %v237_v27 = vadd.f32 1.0, %v297_v23 }
  0xd5   :  { %304 = vrcp.f32 %v237_v27 }
  0xd9   :  { %v299_v31 = vpop.eup %298 }
  0xda   :  { %v301_v32 = vpop.eup %300  ;;  %v147_v33 = vrot.slane %v299_v31, %v142_v29 }
  0xdb   :  { %v303_v35 = vpop.eup %302  ;;  %v250_v37 = vrot.slane %v301_v32, %v142_v29 }
  0xdc   :  { %v156_v38 = vmul.f32 %v147_v33, %v436_v14  ;;  %v157_v39 = vmul.f32 %v147_v33, %v438_v15  ;;  %v158_v41 = vmul.f32 %v147_v33, %v440_v16  ;;  %v159_v42 = vmul.f32 %v147_v33, %v447_v22 }
  0xdd   :  { %v160_v43 = vmul.f32 %v147_v33, %v453_v28  ;;  %v161_v44 = vmul.f32 %v147_v33, %v459_v34  ;;  %v162_v47 = vmul.f32 %v147_v33, %v465_v40  ;;  %v163_v48 = vmul.f32 %v147_v33, %v469_v45 }
  0xde   :  { %172 = vst [vmem:[#allocation8 + $0x50] sm:$0xff] %v156_v38  ;;  %173 = vst [vmem:[#allocation8 + $0x58] sm:$0xff] %v157_v39  ;;  %v253_v14 = vmul.f32 %v250_v37, %v417_v2  ;;  %v254_v15 = vmul.f32 %v250_v37, %v421_v4  ;;  %v143_v49 = vrot.slane %v303_v35, %v142_v29 }
  0xdf   :  { %174 = vst [vmem:[#allocation8 + $0x60] sm:$0xff] %v158_v41  ;;  %175 = vst [vmem:[#allocation8 + $0x68] sm:$0xff] %v159_v42  ;;  %v305_v16 = vpop.eup %304 }
  0xe0   :  { %176 = vst [vmem:[#allocation8 + $0x70] sm:$0xff] %v160_v43  ;;  %177 = vst [vmem:[#allocation8 + $0x78] sm:$0xff] %v161_v44  ;;  %v148_v22 = vmul.f32 %v143_v49, %v423_v5  ;;  %v149_v28 = vmul.f32 %v143_v49, %v425_v6  ;;  %v150_v34 = vmul.f32 %v143_v49, %v429_v8 }
  0xe1   :  { %178 = vst [vmem:[#allocation8 + $0x80] sm:$0xff] %v162_v47  ;;  %179 = vst [vmem:[#allocation8 + $0x88] sm:$0xff] %v163_v48  ;;  %v151_v40 = vmul.f32 %v143_v49, %v433_v11  ;;  %v152_v2 = vmul.f32 %v143_v49, %v442_v18  ;;  %v153_v4 = vmul.f32 %v143_v49, %v449_v24 }
  0xe2   :  { %257 = vst [vmem:[#allocation8 + $0x90] sm:$0xff] %v253_v14  ;;  %258 = vst [vmem:[#allocation8 + $0x98] sm:$0xff] %v254_v15  ;;  %v154_v45 = vmul.f32 %v143_v49, %v455_v30  ;;  %v155_v50 = vmul.f32 %v143_v49, %v461_v36  ;;  %v246_v5 = vrot.slane %v305_v16, %v142_v29 }
  0xe3   :  { %164 = vst [vmem:[#allocation8] sm:$0xff] %v148_v22  ;;  %165 = vst [vmem:[#allocation8 + $0x8] sm:$0xff] %v149_v28 }
  0xe4   :  { %166 = vst [vmem:[#allocation8 + $0x10] sm:$0xff] %v150_v34  ;;  %167 = vst [vmem:[#allocation8 + $0x18] sm:$0xff] %v151_v40  ;;  %v251_v6 = vmul.f32 %v246_v5, %v413_v0  ;;  %v252_v8 = vmul.f32 %v246_v5, %v415_v1 }
  0xe5   :  { %168 = vst [vmem:[#allocation8 + $0x20] sm:$0xff] %v152_v2  ;;  %169 = vst [vmem:[#allocation8 + $0x28] sm:$0xff] %v153_v4 }
  0xe6   :  { %170 = vst [vmem:[#allocation8 + $0x30] sm:$0xff] %v154_v45  ;;  %171 = vst [vmem:[#allocation8 + $0x38] sm:$0xff] %v155_v50 }
  0xe7   :  { %255 = vst [vmem:[#allocation8 + $0x40] sm:$0xff] %v251_v6  ;;  %256 = vst [vmem:[#allocation8 + $0x48] sm:$0xff] %v252_v8 }
  0xe8   :  { %351 = shalt.err (!%p348_p3)
}
  0xe9   :  { %s352_s13 = scalar_lea.hbm %s522_s3, 2560 }
  0xea   :  { %p353_p4 = scmp.ne.s32.totalorder %s522_s3, %s352_s13  ;;  %p356_p5 = scmp.lt.u32.totalorder %s352_s13, %s522_s3 }
  0xec   :  { %p358_p6 = pnand %p356_p5, %p353_p4 }
  0xee   :  { %361 = shalt.err (!%p358_p6)
}
  0xef   :  { %270 = dma.vmem_to_hbm [thread:$0]  %s265_s9, 2560, %s522_s3, [#allocation5], %s370_s26, %s370_s26, %s371_s27  }
  0xf0   :  { %366 = dma.done.wait [#allocation5], 2560  }
  0xf1   :  { %367 = vsyncadd [#allocation5], 4294964736 }
  0xf2   :  { %274 = vsyncpa [#allocation4], 1 }
  0xf3   :  { %275 = vsyncpa [#allocation5], 1 }
  0xf4   :  { %276 = vsyncpa [#allocation6], 1 }

</bundles_post_ra>
